<compile_context>
chip_gen: v7x
topology: tpu7x:2x2x1
jax: 0.10.0
libtpu: 0.0.40
codegen_flags: <defaults>
</compile_context>

<pallas_src>
import math

import jax
import jax.numpy as jnp
from jax.experimental import pallas as pl
from jax.experimental.pallas import tpu as pltpu


# --------------------------------------------------------------------------
# Kernel body: pure copy of the current tile (VMEM -> VMEM move; the HBM
# traffic is the auto-generated pipeline DMAs around it).
# --------------------------------------------------------------------------
def _copy_kernel(x_ref, o_ref):
    o_ref[...] = x_ref[...]


_SMALL_BYTES = 1 << 20                       # <= 1 MiB: single block, no grid
_LANE_CANDIDATES = (8192, 4096, 2048, 1024, 512, 256, 128)


def _sublane_align(dtype) -> int:
    """Row-tile alignment matching sublane packing for the dtype width."""
    bits = jnp.dtype(dtype).itemsize * 8
    if bits >= 32:
        return 8
    if bits == 16:
        return 16
    return 32


def _pick_cols(total: int, shape) -> int:
    """Lane dimension for the 2-D flatten (multiple of 128 whenever possible)."""
    if total % 128 == 0:
        for cand in _LANE_CANDIDATES:
            if total % cand == 0:
                return cand
    # Only reached on the small path or for sub-1024-element tails, where
    # lane masking is negligible.
    last = int(shape[-1]) if len(shape) >= 1 else 1
    return max(last, 1)


def _generation_budget():
    """Per-generation (tile_bytes, vmem_limit_bytes, min_grid_steps, triple_buf)."""
    vmem_cap = None
    try:
        vmem_cap = int(pltpu.get_tpu_info().vmem_capacity_bytes)
    except Exception:
        vmem_cap = None

    if vmem_cap is not None and vmem_cap > (64 << 20):
        # v5e / v6e: 128 MiB physical VMEM.  8 MiB tiles -> 2 arrays x 2
        # pipeline buffers = 32 MiB; raise the scoped limit explicitly so the
        # v5e 16 MiB / v6e 32 MiB defaults don't force tiny tiles.
        return (8 << 20, 40 << 20, 2, False)

    # v7x (64 MiB per TensorCore) or unknown hardware: conservative budget.
    # 4 MiB tiles -> 16 MiB of pipeline buffers per core even when the
    # parallel grid axis is sharded across both TCs.  Triple-buffer the input
    # only on *detected* v7x (small tile vs 3.2 TB/s HBM -> per-step bubble).
    triple = vmem_cap is not None
    return (4 << 20, 28 << 20, 4, triple)


def identity(x, *, donate: bool = False):
    """Identity forward pass: returns a tensor equal to x (same shape/dtype),
    implemented as a Pallas TPU copy kernel.

    donate=True adds input_output_aliases={0: 0}.  Only set it when the caller
    really donates x (e.g. jax.jit(..., donate_argnums=...)); otherwise XLA
    inserts a defensive copy in front of the kernel.
    """
    orig_shape = x.shape
    dtype = x.dtype
    total = math.prod(orig_shape) if orig_shape else 1
    if total == 0:
        return x

    itemsize = jnp.dtype(dtype).itemsize
    total_bytes = total * itemsize
    aliases = {0: 0} if donate else {}

    # ---- small path: whole array is one block (one DMA in, one DMA out) ----
    if total_bytes <= _SMALL_BYTES:
        cols = _pick_cols(total, orig_shape)
        x2 = x.reshape(total // cols, cols)
        out2 = pl.pallas_call(
            _copy_kernel,
            out_shape=jax.ShapeDtypeStruct(x2.shape, dtype),
            input_output_aliases=aliases,
        )(x2)
        return out2.reshape(orig_shape)

    # ---- large, odd total: peel a 128*8-aligned bulk + tiny tail -----------
    if total % 1024 != 0:
        # Keeps >99% of the bytes on the lane-dense tiled path (unmasked vst,
        # large contiguous DMAs).  The split + concatenate costs an extra pass
        # over the data but is still far cheaper than narrow masked stores on
        # a non-128-multiple lane dim.  Rare case for this module.
        flat = x.reshape(total)
        n_bulk = (total // 1024) * 1024
        bulk = identity(flat[:n_bulk])
        tail = identity(flat[n_bulk:])
        return jnp.concatenate([bulk, tail]).reshape(orig_shape)

    # ---- tiled path: byte-budgeted, sublane-aligned row tiles --------------
    cols = _pick_cols(total, orig_shape)      # multiple of 1024 divides total
    rows = total // cols
    x2 = x.reshape(rows, cols)

    tile_bytes, vmem_limit, min_steps, triple_buf = _generation_budget()
    align = _sublane_align(dtype)
    row_bytes = cols * itemsize

    budget_rows = max(tile_bytes // row_bytes, 1)
    tr = max(align, (budget_rows // align) * align)
    if tr > rows:
        tr = rows                             # full-extent block is always legal
    # Keep at least `min_steps` grid steps so both TensorCores (v7x) and their
    # DMA queues stay busy on mid-size inputs.
    if pl.cdiv(rows, tr) < min_steps and rows >= min_steps * align:
        tr = max(align, ((rows // min_steps) // align) * align)
    grid = (pl.cdiv(rows, tr),)               # Pallas masks the ragged last block

    out_spec = pl.BlockSpec((tr, cols), lambda i: (i, 0))
    if triple_buf and grid[0] >= 3:
        try:
            in_spec = pl.BlockSpec((tr, cols), lambda i: (i, 0),
                                   pipeline_mode=pl.Buffered(3))
        except Exception:
            in_spec = pl.BlockSpec((tr, cols), lambda i: (i, 0))
    else:
        in_spec = pl.BlockSpec((tr, cols), lambda i: (i, 0))

    out2 = pl.pallas_call(
        _copy_kernel,
        out_shape=jax.ShapeDtypeStruct((rows, cols), dtype),
        grid_spec=pltpu.PrefetchScalarGridSpec(
            num_scalar_prefetch=0,
            grid=grid,
            in_specs=[in_spec],
            out_specs=out_spec,
        ),
        input_output_aliases=aliases,
        compiler_params=pltpu.CompilerParams(
            # Parallel axis shards the copy across both TensorCores on v7x.
            dimension_semantics=("parallel",),
            vmem_limit_bytes=vmem_limit,
        ),
    )(x2)
    return out2.reshape(orig_shape)


if __name__ == "__main__":
    key = jax.random.PRNGKey(0)

    # Primary example consistent with typical module usage (NCHW), small path.
    x = jax.random.normal(key, (2, 4, 16, 16), dtype=jnp.float32)
    y = jax.block_until_ready(identity(x))
    assert y.shape == x.shape and y.dtype == x.dtype
    assert bool(jnp.all(y == x))

    # Odd shape (total not a multiple of 128) exercises the fallback flatten.
    x_odd = jax.random.normal(jax.random.PRNGKey(1), (3, 5, 7), dtype=jnp.bfloat16)
    y_odd = jax.block_until_ready(identity(x_odd))
    assert y_odd.shape == x_odd.shape and y_odd.dtype == x_odd.dtype
    assert bool(jnp.all(y_odd == x_odd))

    # Larger input exercises the tiled (grid, multi-step) lane-dense path.
    x_big = jax.random.normal(jax.random.PRNGKey(2), (8, 16, 64, 64), dtype=jnp.float32)
    y_big = jax.block_until_ready(identity(x_big))
    assert y_big.shape == x_big.shape and y_big.dtype == x_big.dtype
    assert bool(jnp.all(y_big == x_big))

    # Large odd-sized input exercises the bulk + tail split path.
    x_rag = jax.random.normal(jax.random.PRNGKey(3), (1031, 257), dtype=jnp.float32)
    y_rag = jax.block_until_ready(identity(x_rag))
    assert y_rag.shape == x_rag.shape and y_rag.dtype == x_rag.dtype
    assert bool(jnp.all(y_rag == x_rag))

    # Donated-buffer usage: aliasing only applied when the caller donates.
    x_don = jnp.full((4, 256, 128), 3.0, dtype=jnp.float32)
    ident_donated = jax.jit(lambda t: identity(t, donate=True), donate_argnums=0)
    y_don = jax.block_until_ready(ident_donated(x_don))
    assert y_don.shape == (4, 256, 128) and bool(jnp.all(y_don == 3.0))

    print("KERNEL_OK")
</pallas_src>

<mosaic_0001>
module attributes {stable_mosaic.version = 11 : i64} {
  func.func @_copy_kernel(%arg0: memref<1x2048xf32, #tpu.memory_space<vmem>>, %arg1: memref<1x2048xf32, #tpu.memory_space<vmem>>) attributes {dimension_semantics = [], scalar_prefetch = 0 : i64, scratch_operands = 0 : i64, tpu.core_type = #tpu.core_type<tc>} {
    %c0 = arith.constant 0 : index
    %c0_0 = arith.constant 0 : index
    %0 = vector.load %arg0[%c0, %c0_0] : memref<1x2048xf32, #tpu.memory_space<vmem>>, vector<1x2048xf32>
    %c0_1 = arith.constant 0 : index
    %c0_2 = arith.constant 0 : index
    %1 = vector.load %arg1[%c0_1, %c0_2] : memref<1x2048xf32, #tpu.memory_space<vmem>>, vector<1x2048xf32>
    tpu.vector_store %arg1[%c0_1, %c0_2], %0 {strides = array<i32>} : memref<1x2048xf32, #tpu.memory_space<vmem>>, vector<1x2048xf32>,
    return
  }
}

</mosaic_0001>

<bundles_post_ra>
// kernel: tpu_custom_call.1
= control target key start
LH: loop header
LB: loop body
LE: loop exit
PB: predicated region body
PF: predicated region fallthrough
CT: control target
= control target key end

     0   :  { %6 = vsyncpa [#allocation3], 0  ;;  %s126_s0 = inlined_call_operand.hbm [shape: f32[1,2048], index: 0, kind: input, shape index: {}]   ;;  %s127_s1 = inlined_call_operand.hbm [shape: f32[1,2048], index: 1, kind: output, shape index: {}]  }
   0x1   :  { %7 = vsyncpa [#allocation4], 0  ;;  %s90_s6 = smov [#allocation2]   ;;  %s42_s10 = scalar_lea.hbm %s126_s0, 256 }
   0x2   :  { %s14_s7 = sshll.u32 %s90_s6, 4  ;;  %p43_p0 = scmp.ne.s32.totalorder %s126_s0, %s42_s10  ;;  %s15_s7 = int_to_ptr.vmem [resolvable:$true] %s14_s7 }
   0x3   :  { %p46_p1 = scmp.lt.u32.totalorder %s42_s10, %s126_s0 }
   0x5   :  { %p48_p2 = pnand %p46_p1, %p43_p0 }
   0x7   :  { %51 = shalt.err (!%p48_p2)
}
   0x8   :  { %s52_s15 = scalar_lea.vmem %s15_s7, 256  ;;  %p57_p4 = scmp.lt.s32.totalorder %s15_s7, %s15_s7 }
   0x9   :  { %p53_p3 = scmp.ne.s32.totalorder %s15_s7, %s52_s15  ;;  %p58_p5 = scmp.lt.s32.totalorder %s52_s15, %s52_s15 }
   0xb   :  { %p59_p6 = por %p58_p5, %p57_p4 }
   0xd   :  { %p60_p7 = pnand %p59_p6, %p53_p3 }
   0xf   :  { %63 = shalt.err (!%p60_p7)
}
  0x10   :  { %17 = dma.hbm_to_vmem [thread:$0]  %s126_s0, 256, %s15_s7, [#allocation3]  }
  0x11   :  { %86 = dma.done.wait [#allocation3], 256  }
  0x12   :  { %87 = vsyncadd [#allocation3], 4294967040  ;;  %s91_s18 = smov [#allocation5]   ;;  %v21_v0 = vld [vmem:[#allocation2] sm:$0xff]  ;;  %v22_v1 = vld [vmem:[#allocation2 + $0x8] sm:$0xff] }
  0x13   :  { %s31_s19 = sshll.u32 %s91_s18, 4  ;;  %23 = vst [vmem:[#allocation5] sm:$0xff] %v21_v0  ;;  %24 = vst [vmem:[#allocation5 + $0x8] sm:$0xff] %v22_v1  ;;  %s32_s19 = int_to_ptr.vmem [resolvable:$true] %s31_s19 }
  0x14   :  { %s64_s20 = scalar_lea.vmem %s32_s19, 256  ;;  %p69_p9 = scmp.lt.s32.totalorder %s32_s19, %s32_s19 }
  0x15   :  { %p65_p8 = scmp.ne.s32.totalorder %s32_s19, %s64_s20  ;;  %p70_p10 = scmp.lt.s32.totalorder %s64_s20, %s64_s20 }
  0x17   :  { %p71_p11 = por %p70_p10, %p69_p9 }
  0x19   :  { %p72_p12 = pnand %p71_p11, %p65_p8 }
  0x1b   :  { %75 = shalt.err (!%p72_p12)
}
  0x1c   :  { %s76_s0 = scalar_lea.hbm %s127_s1, 256 }
  0x1d   :  { %p77_p13 = scmp.ne.s32.totalorder %s127_s1, %s76_s0  ;;  %p80_p0 = scmp.lt.u32.totalorder %s76_s0, %s127_s1 }
  0x1f   :  { %p82_p1 = pnand %p80_p0, %p77_p13 }
  0x21   :  { %85 = shalt.err (!%p82_p1)
}
  0x22   :  { %34 = dma.vmem_to_hbm [thread:$0]  %s32_s19, 256, %s127_s1, [#allocation4]  }
  0x23   :  { %88 = dma.done.wait [#allocation4], 256  }
  0x24   :  { %89 = vsyncadd [#allocation4], 4294967040 }
  0x25   :  { %38 = vsyncpa [#allocation3], 1 }
  0x26   :  { %39 = vsyncpa [#allocation4], 1 }

</bundles_post_ra>
